<compile_context>
chip_gen: v5e
topology: v5e:2x2
jax: 0.10.0
libtpu: 0.0.40
codegen_flags: <defaults>
</compile_context>

<pallas_src>
import functools

import jax
import jax.numpy as jnp
from jax.experimental import pallas as pl
from jax.experimental.pallas import tpu as pltpu


def _lstm_stack_kernel(x_ref, wih0_ref, wihr_ref, whh_ref, bias_ref,
                       h0_ref, c0_ref, h_out_ref, c_out_ref,
                       *, num_layers, hidden_size):
    """Whole L-layer LSTM stack in one invocation (statically unrolled)."""
    H = hidden_size
    L = num_layers

    x_bf = x_ref[...].astype(jnp.bfloat16)

    # ---- off-the-serial-chain precompute ------------------------------------
    # gates_pre[l] = h0[l] @ W_hh[l]^T + bias[l]   (+ x @ W_ih[0]^T for l == 0)
    # h0 and x are external inputs, so none of this depends on the layer chain;
    # the LLO scheduler can overlap these MXU pushes with the serial loop.
    gates_pre = []
    for l in range(L):
        g = jnp.dot(h0_ref[l].astype(jnp.bfloat16), whh_ref[l],
                    preferred_element_type=jnp.float32) + bias_ref[l]
        gates_pre.append(g)                        # (B, 4H) f32
    gates_pre[0] = gates_pre[0] + jnp.dot(x_bf, wih0_ref[...],
                                          preferred_element_type=jnp.float32)

    # ---- serial layer chain --------------------------------------------------
    h_prev = None
    for l in range(L):                             # static unroll; L is small
        if l == 0:
            gates = gates_pre[0]
        else:
            gates = gates_pre[l] + jnp.dot(h_prev.astype(jnp.bfloat16),
                                           wihr_ref[l - 1],
                                           preferred_element_type=jnp.float32)

        # g-gate columns were pre-scaled by 2 at pack time, so one full-width
        # sigmoid pass covers all four gates; g = 2*sigmoid(2x) - 1 == tanh(x).
        s = jax.nn.sigmoid(gates)                  # (B, 4H) f32, single EUP pass
        i_g = s[:, 0 * H:1 * H]
        f_g = s[:, 1 * H:2 * H]
        g_g = 2.0 * s[:, 2 * H:3 * H] - 1.0        # quarter-width VALU fixup
        o_g = s[:, 3 * H:4 * H]

        c_new = f_g * c0_ref[l] + i_g * g_g
        h_new = o_g * jnp.tanh(c_new)

        h_out_ref[l] = h_new
        c_out_ref[l] = c_new

        # Next layer's input: dropout == identity in eval mode.
        # TODO(synk): training-mode dropout mask would be applied here.
        h_prev = h_new


def _gate_scale(hidden_size):
    """Per-column scale on the 4H gate axis: 2x on the g gate (tanh->sigmoid)."""
    H = hidden_size
    return jnp.concatenate([jnp.ones((2 * H,), jnp.float32),
                            jnp.full((H,), 2.0, jnp.float32),
                            jnp.ones((H,), jnp.float32)])


def pack_lstm_params(w_ih, w_hh, b_ih, b_hh, hidden_size):
    """One-time packing of the stacked LSTMCell parameters (NOT per step).

    Returns (wih0_t, wihr_t, whh_t, bias):
      wih0_t : (input_size, 4H) bf16  — layer-0 input weights, transposed
      wihr_t : (max(L-1,1), H, 4H) bf16 — layer>=1 input weights, transposed
      whh_t  : (L, H, 4H) bf16        — hidden weights, transposed
      bias   : (L, 1, 4H) f32         — fused b_ih + b_hh
    All g-gate columns are pre-scaled by 2 (tanh-as-sigmoid trick).
    """
    L = len(w_ih)
    H = hidden_size
    scale = _gate_scale(H)                                    # (4H,)

    wih0_t = (w_ih[0].T * scale).astype(jnp.bfloat16)         # (in, 4H)
    whh_t = jnp.stack([w_hh[l].T * scale for l in range(L)],
                      axis=0).astype(jnp.bfloat16)            # (L, H, 4H)
    if L > 1:
        wihr_t = jnp.stack([w_ih[l].T * scale for l in range(1, L)],
                           axis=0).astype(jnp.bfloat16)       # (L-1, H, 4H)
    else:
        wihr_t = jnp.zeros((1, H, 4 * H), jnp.bfloat16)       # dummy, unused
    bias = jnp.stack([(b_ih[l] + b_hh[l]) * scale for l in range(L)],
                     axis=0).reshape(L, 1, 4 * H).astype(jnp.float32)
    return wih0_t, wihr_t, whh_t, bias


def multi_layer_lstm_cell_step(packed, x, h0, c0):
    """One stacked-LSTMCell forward step (eval-mode inter-layer dropout).

    packed : output of pack_lstm_params (call once, reuse every step)
    x      : (B, input_size) f32
    h0, c0 : (L, B, H) f32
    returns (h_out, c_out) each (L, B, H) f32, aliased in place onto h0/c0.
    """
    wih0_t, wihr_t, whh_t, bias = packed
    L, B, H = h0.shape

    kernel = functools.partial(_lstm_stack_kernel, num_layers=L,
                               hidden_size=H)

    grid_spec = pltpu.PrefetchScalarGridSpec(
        num_scalar_prefetch=0,
        grid=(1,),                                  # single step: whole stack
        in_specs=[
            pl.BlockSpec(x.shape, lambda i: (0, 0)),            # x
            pl.BlockSpec(wih0_t.shape, lambda i: (0, 0)),       # W_ih[0]^T
            pl.BlockSpec(wihr_t.shape, lambda i: (0, 0, 0)),    # W_ih[1:]^T
            pl.BlockSpec(whh_t.shape, lambda i: (0, 0, 0)),     # W_hh^T
            pl.BlockSpec(bias.shape, lambda i: (0, 0, 0)),      # fused bias
            pl.BlockSpec((L, B, H), lambda i: (0, 0, 0)),       # h0
            pl.BlockSpec((L, B, H), lambda i: (0, 0, 0)),       # c0
        ],
        out_specs=[
            pl.BlockSpec((L, B, H), lambda i: (0, 0, 0)),       # h_out
            pl.BlockSpec((L, B, H), lambda i: (0, 0, 0)),       # c_out
        ],
    )

    return pl.pallas_call(
        kernel,
        out_shape=(
            jax.ShapeDtypeStruct((L, B, H), jnp.float32),
            jax.ShapeDtypeStruct((L, B, H), jnp.float32),
        ),
        grid_spec=grid_spec,
        # In-place state update: h0 -> h_out, c0 -> c_out.
        input_output_aliases={5: 0, 6: 1},
        compiler_params=pltpu.CompilerParams(
            dimension_semantics=("arbitrary",)),
    )(x, wih0_t, wihr_t, whh_t, bias, h0, c0)


def _reference(x, h0, c0, w_ih, w_hh, b_ih, b_hh, *, emulate_bf16):
    """Pure-JAX reference of the stacked nn.LSTMCell forward (eval mode)."""
    L, _, H = h0.shape

    def cast(a):
        return a.astype(jnp.bfloat16).astype(jnp.float32) if emulate_bf16 else a

    inp = x
    hs, cs = [], []
    for l in range(L):
        gates = (cast(inp) @ cast(w_ih[l].T)
                 + cast(h0[l]) @ cast(w_hh[l].T)
                 + b_ih[l] + b_hh[l])
        i = jax.nn.sigmoid(gates[:, 0 * H:1 * H])
        f = jax.nn.sigmoid(gates[:, 1 * H:2 * H])
        g = jnp.tanh(gates[:, 2 * H:3 * H])
        o = jax.nn.sigmoid(gates[:, 3 * H:4 * H])
        c = f * c0[l] + i * g
        h = o * jnp.tanh(c)
        hs.append(h)
        cs.append(c)
        inp = h  # eval-mode dropout == identity
    return jnp.stack(hs, 0), jnp.stack(cs, 0)


if __name__ == "__main__":
    # Small, module-consistent shapes.
    batch = 8
    input_size = 16
    hidden_size = 32
    num_layers = 3
    dropout = 0.1  # identity in eval mode

    H = hidden_size
    bound = 1.0 / float(hidden_size) ** 0.5

    key = jax.random.PRNGKey(0)
    keys = jax.random.split(key, 4 * num_layers + 3)

    # Deterministic PyTorch-style init: U(-1/sqrt(H), 1/sqrt(H)).
    w_ih, w_hh, b_ih, b_hh = [], [], [], []
    for l in range(num_layers):
        in_dim = input_size if l == 0 else hidden_size
        w_ih.append(jax.random.uniform(keys[4 * l + 0], (4 * H, in_dim),
                                       jnp.float32, minval=-bound, maxval=bound))
        w_hh.append(jax.random.uniform(keys[4 * l + 1], (4 * H, H),
                                       jnp.float32, minval=-bound, maxval=bound))
        b_ih.append(jax.random.uniform(keys[4 * l + 2], (4 * H,),
                                       jnp.float32, minval=-bound, maxval=bound))
        b_hh.append(jax.random.uniform(keys[4 * l + 3], (4 * H,),
                                       jnp.float32, minval=-bound, maxval=bound))

    x = jax.random.normal(keys[-3], (batch, input_size), jnp.float32)
    h0 = jax.random.normal(keys[-2], (num_layers, batch, H), jnp.float32)
    c0 = jax.random.normal(keys[-1], (num_layers, batch, H), jnp.float32)

    # References BEFORE the kernel call (outputs alias the state buffers).
    h_bf, c_bf = _reference(x, h0, c0, w_ih, w_hh, b_ih, b_hh,
                            emulate_bf16=True)
    h_f32, c_f32 = _reference(x, h0, c0, w_ih, w_hh, b_ih, b_hh,
                              emulate_bf16=False)

    # One-time parameter packing (init-time cost, not per step).
    packed = pack_lstm_params(w_ih, w_hh, b_ih, b_hh, hidden_size)

    h_out, c_out = multi_layer_lstm_cell_step(packed, x, h0, c0)
    jax.block_until_ready((h_out, c_out))

    # Tight check against a reference that emulates the kernel's bf16 MXU
    # inputs with f32 accumulation (matches the kernel numerics).
    assert jnp.allclose(h_out, h_bf, atol=1e-3, rtol=1e-3)
    assert jnp.allclose(c_out, c_bf, atol=1e-3, rtol=1e-3)

    # Looser sanity check against the pure-f32 module semantics.
    assert jnp.allclose(h_out, h_f32, atol=5e-2, rtol=5e-2)
    assert jnp.allclose(c_out, c_f32, atol=5e-2, rtol=5e-2)

    print("KERNEL_OK")
</pallas_src>

<mosaic_0001>
module attributes {stable_mosaic.version = 11 : i64} {
  func.func @_lstm_stack_kernel(%arg0: i32, %arg1: memref<8x16xf32, #tpu.memory_space<vmem>>, %arg2: memref<16x128xbf16, #tpu.memory_space<vmem>>, %arg3: memref<2x32x128xbf16, #tpu.memory_space<vmem>>, %arg4: memref<3x32x128xbf16, #tpu.memory_space<vmem>>, %arg5: memref<3x1x128xf32, #tpu.memory_space<vmem>>, %arg6: memref<3x8x32xf32, #tpu.memory_space<vmem>>, %arg7: memref<3x8x32xf32, #tpu.memory_space<vmem>>, %arg8: memref<3x8x32xf32, #tpu.memory_space<vmem>>, %arg9: memref<3x8x32xf32, #tpu.memory_space<vmem>>) attributes {dimension_semantics = [#tpu.dimension_semantics<arbitrary>], iteration_bounds = array<i64: 1>, scalar_prefetch = 0 : i64, scratch_operands = 0 : i64, tpu.core_type = #tpu.core_type<tc>, window_params = [{pipeline_mode = #tpu.pipeline_mode<synchronous>, transform_indices = @transform_0, window_bounds = array<i64: 8, 16>}, {pipeline_mode = #tpu.pipeline_mode<synchronous>, transform_indices = @transform_1, window_bounds = array<i64: 16, 128>}, {pipeline_mode = #tpu.pipeline_mode<synchronous>, transform_indices = @transform_2, window_bounds = array<i64: 2, 32, 128>}, {pipeline_mode = #tpu.pipeline_mode<synchronous>, transform_indices = @transform_3, window_bounds = array<i64: 3, 32, 128>}, {pipeline_mode = #tpu.pipeline_mode<synchronous>, transform_indices = @transform_4, window_bounds = array<i64: 3, 1, 128>}, {pipeline_mode = #tpu.pipeline_mode<synchronous>, transform_indices = @transform_5, window_bounds = array<i64: 3, 8, 32>}, {pipeline_mode = #tpu.pipeline_mode<synchronous>, transform_indices = @transform_6, window_bounds = array<i64: 3, 8, 32>}, {pipeline_mode = #tpu.pipeline_mode<synchronous>, transform_indices = @transform_7, window_bounds = array<i64: 3, 8, 32>}, {pipeline_mode = #tpu.pipeline_mode<synchronous>, transform_indices = @transform_8, window_bounds = array<i64: 3, 8, 32>}]} {
    %c0 = arith.constant 0 : index
    %c0_0 = arith.constant 0 : index
    %0 = vector.load %arg1[%c0, %c0_0] : memref<8x16xf32, #tpu.memory_space<vmem>>, vector<8x16xf32>
    %1 = arith.truncf %0 : vector<8x16xf32> to vector<8x16xbf16>
    %c0_1 = arith.constant 0 : index
    %c0_2 = arith.constant 0 : index
    %c0_3 = arith.constant 0 : index
    %2 = vector.load %arg6[%c0_1, %c0_2, %c0_3] : memref<3x8x32xf32, #tpu.memory_space<vmem>>, vector<1x8x32xf32>
    %3 = vector.shape_cast %2 : vector<1x8x32xf32> to vector<8x32xf32>
    %4 = arith.truncf %3 : vector<8x32xf32> to vector<8x32xbf16>
    %c0_4 = arith.constant 0 : index
    %c0_5 = arith.constant 0 : index
    %c0_6 = arith.constant 0 : index
    %5 = vector.load %arg4[%c0_4, %c0_5, %c0_6] : memref<3x32x128xbf16, #tpu.memory_space<vmem>>, vector<1x32x128xbf16>
    %6 = vector.shape_cast %5 : vector<1x32x128xbf16> to vector<32x128xbf16>
    %cst = arith.constant dense<0.000000e+00> : vector<8x128xf32>
    %7 = tpu.matmul %4, %6, %cst {dimension_numbers = #tpu.dot_dimension_numbers<[1], [0], [0], [1], [0, 0, 1, 1], [], []>} : vector<8x32xbf16>, vector<32x128xbf16>, vector<8x128xf32> -> vector<8x128xf32>
    %c0_7 = arith.constant 0 : index
    %c0_8 = arith.constant 0 : index
    %c0_9 = arith.constant 0 : index
    %8 = vector.load %arg5[%c0_7, %c0_8, %c0_9] : memref<3x1x128xf32, #tpu.memory_space<vmem>>, vector<1x1x128xf32>
    %9 = vector.shape_cast %8 : vector<1x1x128xf32> to vector<1x128xf32>
    %10 = vector.broadcast %9 : vector<1x128xf32> to vector<8x128xf32>
    %11 = arith.addf %7, %10 : vector<8x128xf32>
    %c1 = arith.constant 1 : index
    %c0_10 = arith.constant 0 : index
    %c0_11 = arith.constant 0 : index
    %12 = vector.load %arg6[%c1, %c0_10, %c0_11] : memref<3x8x32xf32, #tpu.memory_space<vmem>>, vector<1x8x32xf32>
    %13 = vector.shape_cast %12 : vector<1x8x32xf32> to vector<8x32xf32>
    %14 = arith.truncf %13 : vector<8x32xf32> to vector<8x32xbf16>
    %c1_12 = arith.constant 1 : index
    %c0_13 = arith.constant 0 : index
    %c0_14 = arith.constant 0 : index
    %15 = vector.load %arg4[%c1_12, %c0_13, %c0_14] : memref<3x32x128xbf16, #tpu.memory_space<vmem>>, vector<1x32x128xbf16>
    %16 = vector.shape_cast %15 : vector<1x32x128xbf16> to vector<32x128xbf16>
    %cst_15 = arith.constant dense<0.000000e+00> : vector<8x128xf32>
    %17 = tpu.matmul %14, %16, %cst_15 {dimension_numbers = #tpu.dot_dimension_numbers<[1], [0], [0], [1], [0, 0, 1, 1], [], []>} : vector<8x32xbf16>, vector<32x128xbf16>, vector<8x128xf32> -> vector<8x128xf32>
    %c1_16 = arith.constant 1 : index
    %c0_17 = arith.constant 0 : index
    %c0_18 = arith.constant 0 : index
    %18 = vector.load %arg5[%c1_16, %c0_17, %c0_18] : memref<3x1x128xf32, #tpu.memory_space<vmem>>, vector<1x1x128xf32>
    %19 = vector.shape_cast %18 : vector<1x1x128xf32> to vector<1x128xf32>
    %20 = vector.broadcast %19 : vector<1x128xf32> to vector<8x128xf32>
    %21 = arith.addf %17, %20 : vector<8x128xf32>
    %c2 = arith.constant 2 : index
    %c0_19 = arith.constant 0 : index
    %c0_20 = arith.constant 0 : index
    %22 = vector.load %arg6[%c2, %c0_19, %c0_20] : memref<3x8x32xf32, #tpu.memory_space<vmem>>, vector<1x8x32xf32>
    %23 = vector.shape_cast %22 : vector<1x8x32xf32> to vector<8x32xf32>
    %24 = arith.truncf %23 : vector<8x32xf32> to vector<8x32xbf16>
    %c2_21 = arith.constant 2 : index
    %c0_22 = arith.constant 0 : index
    %c0_23 = arith.constant 0 : index
    %25 = vector.load %arg4[%c2_21, %c0_22, %c0_23] : memref<3x32x128xbf16, #tpu.memory_space<vmem>>, vector<1x32x128xbf16>
    %26 = vector.shape_cast %25 : vector<1x32x128xbf16> to vector<32x128xbf16>
    %cst_24 = arith.constant dense<0.000000e+00> : vector<8x128xf32>
    %27 = tpu.matmul %24, %26, %cst_24 {dimension_numbers = #tpu.dot_dimension_numbers<[1], [0], [0], [1], [0, 0, 1, 1], [], []>} : vector<8x32xbf16>, vector<32x128xbf16>, vector<8x128xf32> -> vector<8x128xf32>
    %c2_25 = arith.constant 2 : index
    %c0_26 = arith.constant 0 : index
    %c0_27 = arith.constant 0 : index
    %28 = vector.load %arg5[%c2_25, %c0_26, %c0_27] : memref<3x1x128xf32, #tpu.memory_space<vmem>>, vector<1x1x128xf32>
    %29 = vector.shape_cast %28 : vector<1x1x128xf32> to vector<1x128xf32>
    %30 = vector.broadcast %29 : vector<1x128xf32> to vector<8x128xf32>
    %31 = arith.addf %27, %30 : vector<8x128xf32>
    %c0_28 = arith.constant 0 : index
    %c0_29 = arith.constant 0 : index
    %32 = vector.load %arg2[%c0_28, %c0_29] : memref<16x128xbf16, #tpu.memory_space<vmem>>, vector<16x128xbf16>
    %cst_30 = arith.constant dense<0.000000e+00> : vector<8x128xf32>
    %33 = tpu.matmul %1, %32, %cst_30 {dimension_numbers = #tpu.dot_dimension_numbers<[1], [0], [0], [1], [0, 0, 1, 1], [], []>} : vector<8x16xbf16>, vector<16x128xbf16>, vector<8x128xf32> -> vector<8x128xf32>
    %34 = arith.addf %11, %33 : vector<8x128xf32>
    %35 = arith.negf %34 : vector<8x128xf32>
    %36 = math.exp %35 : vector<8x128xf32>
    %cst_31 = arith.constant 1.000000e+00 : f32
    %37 = vector.broadcast %cst_31 : f32 to vector<8x128xf32>
    %38 = arith.addf %37, %36 : vector<8x128xf32>
    %39 = arith.divf %37, %38 : vector<8x128xf32>
    %40 = vector.extract_strided_slice %39 {offsets = [0, 0], sizes = [8, 32], strides = [1, 1]} : vector<8x128xf32> to vector<8x32xf32>
    %41 = vector.extract_strided_slice %39 {offsets = [0, 32], sizes = [8, 32], strides = [1, 1]} : vector<8x128xf32> to vector<8x32xf32>
    %42 = vector.extract_strided_slice %39 {offsets = [0, 64], sizes = [8, 32], strides = [1, 1]} : vector<8x128xf32> to vector<8x32xf32>
    %cst_32 = arith.constant 2.000000e+00 : f32
    %43 = vector.broadcast %cst_32 : f32 to vector<8x32xf32>
    %44 = arith.mulf %43, %42 : vector<8x32xf32>
    %cst_33 = arith.constant 1.000000e+00 : f32
    %45 = vector.broadcast %cst_33 : f32 to vector<8x32xf32>
    %46 = arith.subf %44, %45 : vector<8x32xf32>
    %47 = vector.extract_strided_slice %39 {offsets = [0, 96], sizes = [8, 32], strides = [1, 1]} : vector<8x128xf32> to vector<8x32xf32>
    %c0_34 = arith.constant 0 : index
    %c0_35 = arith.constant 0 : index
    %c0_36 = arith.constant 0 : index
    %48 = vector.load %arg7[%c0_34, %c0_35, %c0_36] : memref<3x8x32xf32, #tpu.memory_space<vmem>>, vector<1x8x32xf32>
    %49 = vector.shape_cast %48 : vector<1x8x32xf32> to vector<8x32xf32>
    %50 = arith.mulf %41, %49 : vector<8x32xf32>
    %51 = arith.mulf %40, %46 : vector<8x32xf32>
    %52 = arith.addf %50, %51 : vector<8x32xf32>
    %53 = math.tanh %52 : vector<8x32xf32>
    %54 = arith.mulf %47, %53 : vector<8x32xf32>
    %c0_37 = arith.constant 0 : index
    %c0_38 = arith.constant 0 : index
    %c0_39 = arith.constant 0 : index
    %55 = vector.load %arg8[%c0_37, %c0_38, %c0_39] : memref<3x8x32xf32, #tpu.memory_space<vmem>>, vector<1x8x32xf32>
    %56 = vector.shape_cast %55 : vector<1x8x32xf32> to vector<8x32xf32>
    %57 = vector.shape_cast %54 : vector<8x32xf32> to vector<1x8x32xf32>
    tpu.vector_store %arg8[%c0_37, %c0_38, %c0_39], %57 {strides = array<i32>} : memref<3x8x32xf32, #tpu.memory_space<vmem>>, vector<1x8x32xf32>,
    %c0_40 = arith.constant 0 : index
    %c0_41 = arith.constant 0 : index
    %c0_42 = arith.constant 0 : index
    %58 = vector.load %arg9[%c0_40, %c0_41, %c0_42] : memref<3x8x32xf32, #tpu.memory_space<vmem>>, vector<1x8x32xf32>
    %59 = vector.shape_cast %58 : vector<1x8x32xf32> to vector<8x32xf32>
    %60 = vector.shape_cast %52 : vector<8x32xf32> to vector<1x8x32xf32>
    tpu.vector_store %arg9[%c0_40, %c0_41, %c0_42], %60 {strides = array<i32>} : memref<3x8x32xf32, #tpu.memory_space<vmem>>, vector<1x8x32xf32>,
    %61 = arith.truncf %54 : vector<8x32xf32> to vector<8x32xbf16>
    %c0_43 = arith.constant 0 : index
    %c0_44 = arith.constant 0 : index
    %c0_45 = arith.constant 0 : index
    %62 = vector.load %arg3[%c0_43, %c0_44, %c0_45] : memref<2x32x128xbf16, #tpu.memory_space<vmem>>, vector<1x32x128xbf16>
    %63 = vector.shape_cast %62 : vector<1x32x128xbf16> to vector<32x128xbf16>
    %cst_46 = arith.constant dense<0.000000e+00> : vector<8x128xf32>
    %64 = tpu.matmul %61, %63, %cst_46 {dimension_numbers = #tpu.dot_dimension_numbers<[1], [0], [0], [1], [0, 0, 1, 1], [], []>} : vector<8x32xbf16>, vector<32x128xbf16>, vector<8x128xf32> -> vector<8x128xf32>
    %65 = arith.addf %21, %64 : vector<8x128xf32>
    %66 = arith.negf %65 : vector<8x128xf32>
    %67 = math.exp %66 : vector<8x128xf32>
    %cst_47 = arith.constant 1.000000e+00 : f32
    %68 = vector.broadcast %cst_47 : f32 to vector<8x128xf32>
    %69 = arith.addf %68, %67 : vector<8x128xf32>
    %70 = arith.divf %68, %69 : vector<8x128xf32>
    %71 = vector.extract_strided_slice %70 {offsets = [0, 0], sizes = [8, 32], strides = [1, 1]} : vector<8x128xf32> to vector<8x32xf32>
    %72 = vector.extract_strided_slice %70 {offsets = [0, 32], sizes = [8, 32], strides = [1, 1]} : vector<8x128xf32> to vector<8x32xf32>
    %73 = vector.extract_strided_slice %70 {offsets = [0, 64], sizes = [8, 32], strides = [1, 1]} : vector<8x128xf32> to vector<8x32xf32>
    %cst_48 = arith.constant 2.000000e+00 : f32
    %74 = vector.broadcast %cst_48 : f32 to vector<8x32xf32>
    %75 = arith.mulf %74, %73 : vector<8x32xf32>
    %cst_49 = arith.constant 1.000000e+00 : f32
    %76 = vector.broadcast %cst_49 : f32 to vector<8x32xf32>
    %77 = arith.subf %75, %76 : vector<8x32xf32>
    %78 = vector.extract_strided_slice %70 {offsets = [0, 96], sizes = [8, 32], strides = [1, 1]} : vector<8x128xf32> to vector<8x32xf32>
    %c1_50 = arith.constant 1 : index
    %c0_51 = arith.constant 0 : index
    %c0_52 = arith.constant 0 : index
    %79 = vector.load %arg7[%c1_50, %c0_51, %c0_52] : memref<3x8x32xf32, #tpu.memory_space<vmem>>, vector<1x8x32xf32>
    %80 = vector.shape_cast %79 : vector<1x8x32xf32> to vector<8x32xf32>
    %81 = arith.mulf %72, %80 : vector<8x32xf32>
    %82 = arith.mulf %71, %77 : vector<8x32xf32>
    %83 = arith.addf %81, %82 : vector<8x32xf32>
    %84 = math.tanh %83 : vector<8x32xf32>
    %85 = arith.mulf %78, %84 : vector<8x32xf32>
    %c1_53 = arith.constant 1 : index
    %c0_54 = arith.constant 0 : index
    %c0_55 = arith.constant 0 : index
    %86 = vector.load %arg8[%c1_53, %c0_54, %c0_55] : memref<3x8x32xf32, #tpu.memory_space<vmem>>, vector<1x8x32xf32>
    %87 = vector.shape_cast %86 : vector<1x8x32xf32> to vector<8x32xf32>
    %88 = vector.shape_cast %85 : vector<8x32xf32> to vector<1x8x32xf32>
    tpu.vector_store %arg8[%c1_53, %c0_54, %c0_55], %88 {strides = array<i32>} : memref<3x8x32xf32, #tpu.memory_space<vmem>>, vector<1x8x32xf32>,
    %c1_56 = arith.constant 1 : index
    %c0_57 = arith.constant 0 : index
    %c0_58 = arith.constant 0 : index
    %89 = vector.load %arg9[%c1_56, %c0_57, %c0_58] : memref<3x8x32xf32, #tpu.memory_space<vmem>>, vector<1x8x32xf32>
    %90 = vector.shape_cast %89 : vector<1x8x32xf32> to vector<8x32xf32>
    %91 = vector.shape_cast %83 : vector<8x32xf32> to vector<1x8x32xf32>
    tpu.vector_store %arg9[%c1_56, %c0_57, %c0_58], %91 {strides = array<i32>} : memref<3x8x32xf32, #tpu.memory_space<vmem>>, vector<1x8x32xf32>,
    %92 = arith.truncf %85 : vector<8x32xf32> to vector<8x32xbf16>
    %c1_59 = arith.constant 1 : index
    %c0_60 = arith.constant 0 : index
    %c0_61 = arith.constant 0 : index
    %93 = vector.load %arg3[%c1_59, %c0_60, %c0_61] : memref<2x32x128xbf16, #tpu.memory_space<vmem>>, vector<1x32x128xbf16>
    %94 = vector.shape_cast %93 : vector<1x32x128xbf16> to vector<32x128xbf16>
    %cst_62 = arith.constant dense<0.000000e+00> : vector<8x128xf32>
    %95 = tpu.matmul %92, %94, %cst_62 {dimension_numbers = #tpu.dot_dimension_numbers<[1], [0], [0], [1], [0, 0, 1, 1], [], []>} : vector<8x32xbf16>, vector<32x128xbf16>, vector<8x128xf32> -> vector<8x128xf32>
    %96 = arith.addf %31, %95 : vector<8x128xf32>
    %97 = arith.negf %96 : vector<8x128xf32>
    %98 = math.exp %97 : vector<8x128xf32>
    %cst_63 = arith.constant 1.000000e+00 : f32
    %99 = vector.broadcast %cst_63 : f32 to vector<8x128xf32>
    %100 = arith.addf %99, %98 : vector<8x128xf32>
    %101 = arith.divf %99, %100 : vector<8x128xf32>
    %102 = vector.extract_strided_slice %101 {offsets = [0, 0], sizes = [8, 32], strides = [1, 1]} : vector<8x128xf32> to vector<8x32xf32>
    %103 = vector.extract_strided_slice %101 {offsets = [0, 32], sizes = [8, 32], strides = [1, 1]} : vector<8x128xf32> to vector<8x32xf32>
    %104 = vector.extract_strided_slice %101 {offsets = [0, 64], sizes = [8, 32], strides = [1, 1]} : vector<8x128xf32> to vector<8x32xf32>
    %cst_64 = arith.constant 2.000000e+00 : f32
    %105 = vector.broadcast %cst_64 : f32 to vector<8x32xf32>
    %106 = arith.mulf %105, %104 : vector<8x32xf32>
    %cst_65 = arith.constant 1.000000e+00 : f32
    %107 = vector.broadcast %cst_65 : f32 to vector<8x32xf32>
    %108 = arith.subf %106, %107 : vector<8x32xf32>
    %109 = vector.extract_strided_slice %101 {offsets = [0, 96], sizes = [8, 32], strides = [1, 1]} : vector<8x128xf32> to vector<8x32xf32>
    %c2_66 = arith.constant 2 : index
    %c0_67 = arith.constant 0 : index
    %c0_68 = arith.constant 0 : index
    %110 = vector.load %arg7[%c2_66, %c0_67, %c0_68] : memref<3x8x32xf32, #tpu.memory_space<vmem>>, vector<1x8x32xf32>
    %111 = vector.shape_cast %110 : vector<1x8x32xf32> to vector<8x32xf32>
    %112 = arith.mulf %103, %111 : vector<8x32xf32>
    %113 = arith.mulf %102, %108 : vector<8x32xf32>
    %114 = arith.addf %112, %113 : vector<8x32xf32>
    %115 = math.tanh %114 : vector<8x32xf32>
    %116 = arith.mulf %109, %115 : vector<8x32xf32>
    %c2_69 = arith.constant 2 : index
    %c0_70 = arith.constant 0 : index
    %c0_71 = arith.constant 0 : index
    %117 = vector.load %arg8[%c2_69, %c0_70, %c0_71] : memref<3x8x32xf32, #tpu.memory_space<vmem>>, vector<1x8x32xf32>
    %118 = vector.shape_cast %117 : vector<1x8x32xf32> to vector<8x32xf32>
    %119 = vector.shape_cast %116 : vector<8x32xf32> to vector<1x8x32xf32>
    tpu.vector_store %arg8[%c2_69, %c0_70, %c0_71], %119 {strides = array<i32>} : memref<3x8x32xf32, #tpu.memory_space<vmem>>, vector<1x8x32xf32>,
    %c2_72 = arith.constant 2 : index
    %c0_73 = arith.constant 0 : index
    %c0_74 = arith.constant 0 : index
    %120 = vector.load %arg9[%c2_72, %c0_73, %c0_74] : memref<3x8x32xf32, #tpu.memory_space<vmem>>, vector<1x8x32xf32>
    %121 = vector.shape_cast %120 : vector<1x8x32xf32> to vector<8x32xf32>
    %122 = vector.shape_cast %114 : vector<8x32xf32> to vector<1x8x32xf32>
    tpu.vector_store %arg9[%c2_72, %c0_73, %c0_74], %122 {strides = array<i32>} : memref<3x8x32xf32, #tpu.memory_space<vmem>>, vector<1x8x32xf32>,
    return
  }
  func.func @transform_0(%arg0: i32) -> (i32, i32) {
    %c0_i32 = arith.constant 0 : i32
    %c0_i32_0 = arith.constant 0 : i32
    %c0_i32_1 = arith.constant 0 : i32
    return %c0_i32, %c0_i32_0 : i32, i32
  }
  func.func @transform_1(%arg0: i32) -> (i32, i32) {
    %c0_i32 = arith.constant 0 : i32
    %c0_i32_0 = arith.constant 0 : i32
    %c0_i32_1 = arith.constant 0 : i32
    return %c0_i32, %c0_i32_0 : i32, i32
  }
  func.func @transform_2(%arg0: i32) -> (i32, i32, i32) {
    %c0_i32 = arith.constant 0 : i32
    %c0_i32_0 = arith.constant 0 : i32
    %c0_i32_1 = arith.constant 0 : i32
    %c0_i32_2 = arith.constant 0 : i32
    return %c0_i32, %c0_i32_0, %c0_i32_1 : i32, i32, i32
  }
  func.func @transform_3(%arg0: i32) -> (i32, i32, i32) {
    %c0_i32 = arith.constant 0 : i32
    %c0_i32_0 = arith.constant 0 : i32
    %c0_i32_1 = arith.constant 0 : i32
    %c0_i32_2 = arith.constant 0 : i32
    return %c0_i32, %c0_i32_0, %c0_i32_1 : i32, i32, i32
  }
  func.func @transform_4(%arg0: i32) -> (i32, i32, i32) {
    %c0_i32 = arith.constant 0 : i32
    %c0_i32_0 = arith.constant 0 : i32
    %c0_i32_1 = arith.constant 0 : i32
    %c0_i32_2 = arith.constant 0 : i32
    return %c0_i32, %c0_i32_0, %c0_i32_1 : i32, i32, i32
  }
  func.func @transform_5(%arg0: i32) -> (i32, i32, i32) {
    %c0_i32 = arith.constant 0 : i32
    %c0_i32_0 = arith.constant 0 : i32
    %c0_i32_1 = arith.constant 0 : i32
    %c0_i32_2 = arith.constant 0 : i32
    return %c0_i32, %c0_i32_0, %c0_i32_1 : i32, i32, i32
  }
  func.func @transform_6(%arg0: i32) -> (i32, i32, i32) {
    %c0_i32 = arith.constant 0 : i32
    %c0_i32_0 = arith.constant 0 : i32
    %c0_i32_1 = arith.constant 0 : i32
    %c0_i32_2 = arith.constant 0 : i32
    return %c0_i32, %c0_i32_0, %c0_i32_1 : i32, i32, i32
  }
  func.func @transform_7(%arg0: i32) -> (i32, i32, i32) {
    %c0_i32 = arith.constant 0 : i32
    %c0_i32_0 = arith.constant 0 : i32
    %c0_i32_1 = arith.constant 0 : i32
    %c0_i32_2 = arith.constant 0 : i32
    return %c0_i32, %c0_i32_0, %c0_i32_1 : i32, i32, i32
  }
  func.func @transform_8(%arg0: i32) -> (i32, i32, i32) {
    %c0_i32 = arith.constant 0 : i32
    %c0_i32_0 = arith.constant 0 : i32
    %c0_i32_1 = arith.constant 0 : i32
    %c0_i32_2 = arith.constant 0 : i32
    return %c0_i32, %c0_i32_0, %c0_i32_1 : i32, i32, i32
  }
}

</mosaic_0001>

<bundles_post_ra>
// kernel: tpu_custom_call.1
= control target key start
LH: loop header
LB: loop body
LE: loop exit
PB: predicated region body
PF: predicated region fallthrough
CT: control target
= control target key end

     0   :  { %14 = vsyncpa [#allocation3], 0  ;;  %s895_s0 = inlined_call_operand.vmem [shape: f32[8,16], index: 0, kind: input, shape index: {}]   ;;  %s896_s1 = inlined_call_operand.vmem [shape: bf16[16,128], index: 1, kind: input, shape index: {}]   ;;  %s897_s2 = inlined_call_operand.hbm [shape: bf16[2,32,128], index: 2, kind: input, shape index: {}]   ;;  %s898_s3 = inlined_call_operand.vmem [shape: bf16[3,32,128], index: 3, kind: input, shape index: {}]   ;;  %s899_s4 = inlined_call_operand.vmem [shape: f32[3,1,128], index: 4, kind: input, shape index: {}]   ;;  %s900_s5 = inlined_call_operand.hbm [shape: f32[3,8,32], index: 5, kind: input, shape index: {}, may-alias: {5,7}]   ;;  %s901_s6 = inlined_call_operand.hbm [shape: f32[3,8,32], index: 6, kind: input, shape index: {}, may-alias: {6,8}]   ;;  %s902_s7 = inlined_call_operand.hbm [shape: f32[3,8,32], index: 7, kind: output, shape index: {0}, may-alias: {5,7}]   ;;  %s903_s8 = inlined_call_operand.hbm [shape: f32[3,8,32], index: 8, kind: output, shape index: {1}, may-alias: {6,8}]  }
   0x1   :  { %15 = vsyncpa [#allocation6], 0 }
   0x2   :  { %16 = vsyncpa [#allocation4], 0  ;;  %s43_s29 = sshll.u32 %s900_s5, 4  ;;  %s44_s29 = int_to_ptr.hbm [resolvable:$true] %s43_s29 }
   0x3   :  { %17 = vsyncpa [#allocation10], 0  ;;  %s742_s30 = smov [#allocation5]   ;;  %s26_s12 = sshll.u32 %s897_s2, 4  ;;  %s27_s12 = int_to_ptr.hbm [resolvable:$true] %s26_s12 }
   0x4   :  { %s45_s9 = sshll.u32 %s742_s30, 4  ;;  %s743_s13 = smov 128   ;;  %s46_s9 = int_to_ptr.vmem [resolvable:$true] %s45_s9 }
   0x5   :  { %s744_s14 = smov 8   ;;  %s745_s15 = smov [#allocation2]  }
   0x6   :  { %51 = dma.hbm_to_vmem [thread:$0]  %s44_s29, 384, %s46_s9, [#allocation6], %s743_s13, %s743_s13, %s744_s14  }
   0x7   :  { %s28_s16 = sshll.u32 %s745_s15, 4  ;;  %s746_s5 = smov 64   ;;  %s29_s16 = int_to_ptr.vmem [resolvable:$true] %s28_s16 }
   0x8   :  { %s747_s17 = smov 4   ;;  %s56_s20 = sshll.u32 %s901_s6, 4  ;;  %s57_s20 = int_to_ptr.hbm [resolvable:$true] %s56_s20 }
   0x9   :  { %34 = dma.hbm_to_vmem [thread:$0]  %s27_s12, 512, %s29_s16, [#allocation3], %s746_s5, %s746_s5, %s747_s17  }
   0xa   :  { %s748_s2 = smov [#allocation7]  }
   0xb   :  { %s58_s21 = sshll.u32 %s748_s2, 4  ;;  %s59_s21 = int_to_ptr.vmem [resolvable:$true] %s58_s21 }
   0xc   :  { %64 = dma.hbm_to_vmem [thread:$0]  %s57_s20, 384, %s59_s21, [#allocation6], %s743_s13, %s743_s13, %s744_s14  }
   0xd   :  { %734 = dma.done.wait [#allocation3], 512  }
   0xe   :  { %735 = vsyncadd [#allocation3], 4294966784 }
   0xf   :  { %736 = dma.done.wait [#allocation6], 768  }
  0x10   :  { %737 = vsyncadd [#allocation6], 4294966528  ;;  %v572_v0 = vld [vmem:[%s898_s3 + $0x8] sm:$0xff]  ;;  %v577_v1 = vld [vmem:[%s896_s1] sm:$0xff]  ;;  %vm209_vm0 = vcmask 130048   ;;  %vm102_vm1 = vcmask 261120  }
  0x11   :  { %v78_v2 = vld [vmem:[%s895_s0] sm:$0xff]  ;;  %112 = vmatpush.bf16.msra.mxu0 %v572_v0  ;;  %220 = vmatpush.bf16.msra.mxu3 %v577_v1  ;;  %v248_v29 = vld [vmem:[#allocation7] sm:$0xff]  ;;  %s749_s0 = smov 32   ;;  %v579_v37 = vld [vmem:[#allocation2 + $0x8] sm:$0xff]  ;;  %s750_s16 = smov 96  }
  0x12   :  { %v79_v3 = vpack.c.bf16 %v78_v2, %v78_v2  ;;  %v571_v4 = vld [vmem:[%s898_s3] sm:$0xff]  ;;  %v574_v38 = vld [vmem:[%s898_s3 + $0x18] sm:$0xff]  ;;  %v573_v40 = vld [vmem:[%s898_s3 + $0x10] sm:$0xff]  ;;  %s486_s24 = sshll.u32 %s903_s8, 4  ;;  %s473_s27 = sshll.u32 %s902_s7, 4  ;;  %s487_s24 = int_to_ptr.hbm [resolvable:$true] %s486_s24  ;;  %s474_s27 = int_to_ptr.hbm [resolvable:$true] %s473_s27 }
  0x13   :  { %v80_v5 = vld [vmem:[#allocation5] sm:$0xff]  ;;  %153 = vmatpush.bf16.msra.mxu1 %v574_v38  ;;  %v120_v41 = vld [vmem:[#allocation5 + $0x8] sm:$0xff] }
  0x14   :  { %546 = vmatmul.msk.bf16.vlgmr.msra.gmra.mxu3 %vm209_vm0, %v79_v3  ;;  %v81_v6 = vpack.c.bf16 %v80_v5, %v80_v5  ;;  %v593_v7 = vld [vmem:[%s899_s4] ss:$0 sm:$0xff]  ;;  %v121_v42 = vpack.c.bf16 %v120_v41, %v120_v41  ;;  %v594_v50 = vld [vmem:[%s899_s4 + $0x1] ss:$0 sm:$0xff] }
  0x15   :  { %113 = vmatpush.bf16.msra.mxu0 %v571_v4  ;;  %309 = vmatpush.bf16.msrb.mxu3 %v579_v37  ;;  %v578_v39 = vld [vmem:[#allocation2] sm:$0xff] }
  0x16   :  { %v339_v46 = vld [vmem:[#allocation7 + $0x8] sm:$0xff] }
  0x17   :  { %154 = vmatpush.bf16.msra.mxu1 %v573_v40 }
  0x18   :  { %513 = vmatmul.msk.bf16.vlgmr.msra.gmra.mxu0 %vm102_vm1, %v81_v6 }
  0x19   :  { %310 = vmatpush.bf16.msrb.mxu3 %v578_v39 }
  0x1a   :  { %527 = vmatmul.msk.bf16.vlgmr.msra.gmra.mxu1 %vm102_vm1, %v121_v42 }
  0x95   :  { %v115_v8 = vpop.f32.mrf.mxu0 }
  0x96   :  { %v116_v9 = vadd.f32 %v593_v7, %v115_v8 }
  0x97   :  { %v222_v10 = vpop.f32.mrf.mxu3  ;;  %v156_v48 = vpop.f32.mrf.mxu1 }
  0x98   :  { %v226_v11 = vadd.f32 %v222_v10, %v116_v9  ;;  %v157_v51 = vadd.f32 %v594_v50, %v156_v48 }
  0x9a   :  { %v547_v12 = vmul.f32 -1.442695, %v226_v11 }
  0x9c   :  { %596 = vpow2.f32 %v547_v12 }
  0x9d   :  { %v117_v13 = vpop.f32.mrf.mxu0 }
  0x9e   :  { %v433_v13 = vld [vmem:[#allocation7 + $0x10] sm:$0xff] }
  0x9f   :  { %v224_v14 = vpop.f32.mrf.mxu3  ;;  %v158_v49 = vpop.f32.mrf.mxu1 }
  0xa0   :  { %v576_v14 = vld [vmem:[%s898_s3 + $0x28] sm:$0xff] }
  0xa1   :  { %194 = vmatpush.bf16.msra.mxu2 %v576_v14 }
  0xa2   :  { %v597_v15 = vpop.eup %596 }
  0xa3   :  { %v230_v16 = vadd.f32 1.0, %v597_v15  ;;  %v581_v15 = vld [vmem:[#allocation2 + $0x18] sm:$0xff] }
  0xa4   :  { %403 = vmatpush.bf16.msrb.mxu0 %v581_v15 }
  0xa5   :  { %598 = vrcp.f32 %v230_v16  ;;  %v242_v20 = vand.u32 2147483648, %v230_v16  ;;  %v240_v22 = vand.u32 2147483647, %v230_v16  ;;  %vm236_vm3 = vweird.f32 %v230_v16 }
  0xa7   :  { %v243_v24 = vor.u32 1.1754944e-38, %v242_v20  ;;  %vm241_vm5 = vcmp.eq.f32.partialorder %v240_v22, 8.507059e+37 }
  0xab   :  { %v599_v17 = vpop.eup %598 }
  0xac   :  { %v232_v18 = vmul.f32 %v599_v17, %v230_v16  ;;  %vm237_vm2 = vweird.f32 %v599_v17  ;;  %v575_v16 = vld [vmem:[%s898_s3 + $0x20] sm:$0xff] }
  0xad   :  { %vm238_vm4 = vmor %vm236_vm3, %vm237_vm2  ;;  %195 = vmatpush.bf16.msra.mxu2 %v575_v16 }
  0xae   :  { %v233_v19 = vsub.f32 1.0, %v232_v18  ;;  %v580_v18 = vld [vmem:[#allocation2 + $0x10] sm:$0xff] }
  0xaf   :  { %404 = vmatpush.bf16.msrb.mxu0 %v580_v18 }
  0xb0   :  { %v234_v21 = vmul.f32 %v599_v17, %v233_v19 }
  0xb2   :  { %v235_v23 = vadd.f32 %v599_v17, %v234_v21 }
  0xb4   :  { %v239_v25 = vsel %vm238_vm4, %v599_v17, %v235_v23  ;;  %v161_v17 = vld [vmem:[#allocation5 + $0x10] sm:$0xff] }
  0xb5   :  { %v244_v26 = vsel %vm241_vm5, %v243_v24, %v239_v25  ;;  %v162_v19 = vpack.c.bf16 %v161_v17, %v161_v17 }
  0xb6   :  { %v246_v27 = vmul.f32 2.0, %v244_v26 }
  0xb7   :  { %541 = vmatmul.msk.bf16.vlgmr.msra.gmra.mxu2 %vm102_vm1, %v162_v19 }
  0xb8   :  { %v548_v28 = vadd.f32 -1.0, %v246_v27 }
  0xba   :  { %255 = vrot.lane.b32.xlu0 %v548_v28, %s746_s5 }
  0xc2   :  { %250 = vrot.lane.b32.xlu0 %v248_v29, %s749_s0  ;;  %v595_v29 = vld [vmem:[%s899_s4 + $0x2] ss:$0 sm:$0xff]  ;;  %s751_s4 = smov [#allocation9]  }
  0xc3   :  { %s484_s21 = sshll.u32 %s751_s4, 4  ;;  %s485_s21 = int_to_ptr.vmem [resolvable:$true] %s484_s21 }
  0xca   :  { %341 = vrot.lane.b32.xlu0 %v339_v46, %s749_s0 }
 0x12c   :  { %v256_v30 = vpop.permute.xlu0 %255 }
 0x12d   :  { %v258_v31 = vmul.f32 %v256_v30, %v244_v26 }
 0x12f   :  { %260 = vrot.lane.b32.xlu1 %v258_v31, %s749_s0 }
 0x134   :  { %v251_v32 = vpop.permute.xlu0 %250 }
 0x135   :  { %v253_v33 = vmul.f32 %v251_v32, %v244_v26 }
 0x13a   :  { %v197_v27 = vpop.f32.mrf.mxu2 }
 0x13b   :  { %v198_v30 = vadd.f32 %v595_v29, %v197_v27 }
 0x13c   :  { %v342_v8 = vpop.permute.xlu0 %341 }
 0x142   :  { %v199_v28 = vpop.f32.mrf.mxu2 }
 0x1a1   :  { %v261_v34 = vpop.permute.xlu1 %260 }
 0x1a2   :  { %v834_v35 = vadd.f32 %v261_v34, %v253_v33 }
 0x1a4   :  { %600 = vtanh.f32 %v834_v35 }
 0x1aa   :  { %v601_v36 = vpop.eup %600 }
 0x1ab   :  { %266 = vrot.lane.b32.xlu1 %v601_v36, %s746_s5 }
 0x21d   :  { %v267_v43 = vpop.permute.xlu1 %266 }
 0x21e   :  { %v269_v44 = vmul.f32 %v267_v43, %v244_v26 }
 0x220   :  { %v280_v45 = vpack.c.bf16 %v269_v44, %v269_v44 }
 0x222   :  { %286 = vrot.lane.b32.xlu2 %v280_v45, %s749_s0 }
 0x27c   :  { %v287_v47 = vpop.permute.xlu2 %286 }
 0x27d   :  { %557 = vmatmul.msk.bf16.vlgmr.msrb.gmra.mxu3 %vm102_vm1, %v287_v47 }
 0x300   :  { %v312_v52 = vpop.f32.mrf.mxu3 }
 0x301   :  { %v316_v53 = vadd.f32 %v312_v52, %v157_v51 }
 0x303   :  { %v558_v54 = vmul.f32 -1.442695, %v316_v53 }
 0x305   :  { %602 = vpow2.f32 %v558_v54 }
 0x308   :  { %v314_v55 = vpop.f32.mrf.mxu3 }
 0x30b   :  { %v603_v56 = vpop.eup %602 }
 0x30c   :  { %v320_v57 = vadd.f32 1.0, %v603_v56 }
 0x30e   :  { %604 = vrcp.f32 %v320_v57  ;;  %v332_v61 = vand.u32 2147483648, %v320_v57  ;;  %v330_v63 = vand.u32 2147483647, %v320_v57  ;;  %vm326_vm7 = vweird.f32 %v320_v57 }
 0x310   :  { %v333_v1 = vor.u32 1.1754944e-38, %v332_v61  ;;  %vm331_vm9 = vcmp.eq.f32.partialorder %v330_v63, 8.507059e+37 }
 0x314   :  { %v605_v58 = vpop.eup %604 }
 0x315   :  { %v322_v59 = vmul.f32 %v605_v58, %v320_v57  ;;  %vm327_vm6 = vweird.f32 %v605_v58 }
 0x316   :  { %vm328_vm8 = vmor %vm326_vm7, %vm327_vm6 }
 0x317   :  { %v323_v60 = vsub.f32 1.0, %v322_v59 }
 0x319   :  { %v324_v62 = vmul.f32 %v605_v58, %v323_v60 }
 0x31b   :  { %v325_v0 = vadd.f32 %v605_v58, %v324_v62 }
 0x31d   :  { %v329_v2 = vsel %vm328_vm8, %v605_v58, %v325_v0 }
 0x31e   :  { %v334_v3 = vsel %vm331_vm9, %v333_v1, %v329_v2 }
 0x31f   :  { %v336_v4 = vmul.f32 2.0, %v334_v3  ;;  %v344_v9 = vmul.f32 %v342_v8, %v334_v3 }
 0x321   :  { %v559_v5 = vadd.f32 -1.0, %v336_v4 }
 0x323   :  { %346 = vrot.lane.b32.xlu2 %v559_v5, %s746_s5 }
 0x37d   :  { %v347_v6 = vpop.permute.xlu2 %346 }
 0x37e   :  { %v349_v7 = vmul.f32 %v347_v6, %v334_v3 }
 0x380   :  { %351 = vrot.lane.b32.xlu1 %v349_v7, %s749_s0 }
 0x3f2   :  { %v352_v10 = vpop.permute.xlu1 %351 }
 0x3f3   :  { %v354_v11 = vadd.f32 %v352_v10, %v344_v9 }
 0x3f5   :  { %606 = vtanh.f32 %v354_v11 }
 0x3fb   :  { %v607_v12 = vpop.eup %606 }
 0x3fc   :  { %357 = vrot.lane.b32.xlu2 %v607_v12, %s746_s5 }
 0x404   :  { %435 = vrot.lane.b32.xlu2 %v433_v13, %s749_s0 }
 0x40c   :  { %271 = vrot.lane.b32.xlu2 %v269_v44, %s749_s0 }
 0x414   :  { %368 = vrot.lane.b32.xlu2 %v354_v11, %s750_s16 }
 0x456   :  { %v358_v20 = vpop.permute.xlu2 %357 }
 0x457   :  { %v360_v21 = vmul.f32 %v358_v20, %v334_v3 }
 0x459   :  { %v373_v22 = vpack.c.bf16 %v360_v21, %v360_v21 }
 0x45b   :  { %380 = vrot.lane.b32.xlu0 %v373_v22, %s749_s0 }
 0x45e   :  { %v436_v23 = vpop.permute.xlu2 %435 }
 0x466   :  { %v272_v24 = vpop.permute.xlu2 %271 }
 0x467   :  { %274 = vst.msk [vmem:[#allocation8] sm:$0xff] %vm102_vm1, %v272_v24 }
 0x46e   :  { %v369_v25 = vpop.permute.xlu2 %368 }
 0x46f   :  { %372 = vst.msk [vmem:[#allocation9 + $0x8] sm:$0xff] %vm102_vm1, %v369_v25 }
 0x4cd   :  { %v381_v26 = vpop.permute.xlu0 %380 }
 0x4ce   :  { %568 = vmatmul.msk.bf16.vlgmr.msrb.gmra.mxu0 %vm102_vm1, %v381_v26 }
 0x54b   :  { %v406_v31 = vpop.f32.mrf.mxu0 }
 0x54c   :  { %v410_v32 = vadd.f32 %v406_v31, %v198_v30 }
 0x54e   :  { %v569_v33 = vmul.f32 -1.442695, %v410_v32 }
 0x550   :  { %608 = vpow2.f32 %v569_v33 }
 0x553   :  { %v408_v34 = vpop.f32.mrf.mxu0 }
 0x556   :  { %v609_v36 = vpop.eup %608 }
 0x557   :  { %v414_v37 = vadd.f32 1.0, %v609_v36 }
 0x559   :  { %610 = vrcp.f32 %v414_v37  ;;  %v426_v41 = vand.u32 2147483648, %v414_v37  ;;  %v424_v43 = vand.u32 2147483647, %v414_v37  ;;  %vm420_vm11 = vweird.f32 %v414_v37 }
 0x55b   :  { %v427_v45 = vor.u32 1.1754944e-38, %v426_v41  ;;  %vm425_vm13 = vcmp.eq.f32.partialorder %v424_v43, 8.507059e+37 }
 0x55f   :  { %v611_v38 = vpop.eup %610 }
 0x560   :  { %v416_v39 = vmul.f32 %v611_v38, %v414_v37  ;;  %vm421_vm10 = vweird.f32 %v611_v38 }
 0x561   :  { %vm422_vm12 = vmor %vm420_vm11, %vm421_vm10 }
 0x562   :  { %v417_v40 = vsub.f32 1.0, %v416_v39 }
 0x564   :  { %v418_v42 = vmul.f32 %v611_v38, %v417_v40 }
 0x566   :  { %v419_v44 = vadd.f32 %v611_v38, %v418_v42 }
 0x568   :  { %v423_v46 = vsel %vm422_vm12, %v611_v38, %v419_v44 }
 0x569   :  { %v428_v47 = vsel %vm425_vm13, %v427_v45, %v423_v46 }
 0x56a   :  { %v430_v48 = vmul.f32 2.0, %v428_v47  ;;  %v438_v52 = vmul.f32 %v436_v23, %v428_v47 }
 0x56c   :  { %v570_v49 = vadd.f32 -1.0, %v430_v48 }
 0x56e   :  { %440 = vrot.lane.b32.xlu1 %v570_v49, %s746_s5 }
 0x5e0   :  { %v441_v50 = vpop.permute.xlu1 %440 }
 0x5e1   :  { %v443_v51 = vmul.f32 %v441_v50, %v428_v47 }
 0x5e3   :  { %445 = vrot.lane.b32.xlu0 %v443_v51, %s749_s0 }
 0x5eb   :  { %276 = vrot.lane.b32.xlu0 %v834_v35, %s750_s16 }
 0x655   :  { %v446_v53 = vpop.permute.xlu0 %445 }
 0x656   :  { %v448_v54 = vadd.f32 %v446_v53, %v438_v52 }
 0x658   :  { %612 = vtanh.f32 %v448_v54 }
 0x65d   :  { %v277_v55 = vpop.permute.xlu0 %276 }
 0x65e   :  { %v613_v56 = vpop.eup %612  ;;  %279 = vst.msk [vmem:[#allocation9] sm:$0xff] %vm102_vm1, %v277_v55 }
 0x65f   :  { %451 = vrot.lane.b32.xlu1 %v613_v56, %s746_s5  ;;  %s752_s5 = smov [#allocation8]  }
 0x660   :  { %s471_s25 = sshll.u32 %s752_s5, 4  ;;  %s472_s25 = int_to_ptr.vmem [resolvable:$true] %s471_s25 }
 0x667   :  { %362 = vrot.lane.b32.xlu1 %v360_v21, %s749_s0 }
 0x66f   :  { %462 = vrot.lane.b32.xlu1 %v448_v54, %s750_s16 }
 0x6d1   :  { %v452_v57 = vpop.permute.xlu1 %451 }
 0x6d2   :  { %v454_v58 = vmul.f32 %v452_v57, %v428_v47 }
 0x6d4   :  { %456 = vrot.lane.b32.xlu0 %v454_v58, %s749_s0 }
 0x6d9   :  { %v363_v59 = vpop.permute.xlu1 %362 }
 0x6da   :  { %366 = vst.msk [vmem:[#allocation8 + $0x8] sm:$0xff] %vm102_vm1, %v363_v59 }
 0x6e1   :  { %v463_v35 = vpop.permute.xlu1 %462 }
 0x6e2   :  { %466 = vst.msk [vmem:[#allocation9 + $0x10] sm:$0xff] %vm102_vm1, %v463_v35 }
 0x6e3   :  { %492 = dma.vmem_to_hbm [thread:$0]  %s485_s21, 384, %s487_s24, [#allocation10], %s743_s13, %s743_s13, %s744_s14  }
 0x746   :  { %v457_v60 = vpop.permute.xlu0 %456 }
 0x747   :  { %460 = vst.msk [vmem:[#allocation8 + $0x10] sm:$0xff] %vm102_vm1, %v457_v60 }
 0x748   :  { %479 = dma.vmem_to_hbm [thread:$0]  %s472_s25, 384, %s474_s27, [#allocation4], %s743_s13, %s743_s13, %s744_s14  }
 0x749   :  { %738 = dma.done.wait [#allocation4], 384  }
 0x74a   :  { %739 = vsyncadd [#allocation4], 4294966912 }
 0x74b   :  { %740 = dma.done.wait [#allocation10], 384  }
 0x74c   :  { %741 = vsyncadd [#allocation10], 4294966912 }
 0x74d   :  { %501 = vsyncpa [#allocation3], 1 }
 0x74e   :  { %502 = vsyncpa [#allocation6], 1 }
 0x74f   :  { %503 = vsyncpa [#allocation4], 1 }
 0x750   :  { %504 = vsyncpa [#allocation10], 1 }

</bundles_post_ra>
